<compile_context>
chip_gen: v7x
topology: tpu7x:2x2x1
jax: 0.10.0
libtpu: 0.0.40
codegen_flags: <defaults>
</compile_context>

<pallas_src>
import functools

import jax
import jax.numpy as jnp
from jax.experimental import pallas as pl
from jax.experimental.pallas import tpu as pltpu

_LANE = 128


def _cnn_kernel(cols_ref, w_ref, b_ref, o_ref):
    """Fused conv-as-matmul + max-over-time + bias + ReLU.

    cols_ref: (B, L_out, K*C_in)   im2col LHS
    w_ref:    (K*C_in, C_out_pad)  folded conv weight (lane-padded)
    b_ref:    (1, C_out_pad)       bias (lane-padded, f32)
    o_ref:    (B, C_out_pad)       output (lane-dense store)
    """
    # Single 160-deep contraction on the MXU, f32 accumulation.
    y = jax.lax.dot_general(
        cols_ref[...], w_ref[...],
        dimension_numbers=(((2,), (0,)), ((), ())),
        preferred_element_type=jnp.float32)            # (B, L_out, C_out_pad)
    pooled = jnp.max(y, axis=1)                         # (B, C_out_pad)
    # bias + ReLU hoisted past the max: max_t ReLU(y_t + b) == ReLU(max_t y_t + b)
    o_ref[...] = jnp.maximum(pooled + b_ref[...], 0.0).astype(o_ref.dtype)


@functools.partial(jax.jit, static_argnames=("compute_dtype",))
def cnn_forward(x_ncl, weight_ock, bias_o, *, compute_dtype=jnp.float32):
    """Mirrors CNN.forward.

    Args:
      x_ncl:      (B, C_in, L)     float32  (PyTorch NCL conv1d input, B = b*sen_len)
      weight_ock: (C_out, C_in, K) float32  (PyTorch Conv1d weight layout)
      bias_o:     (C_out,)         float32
      compute_dtype: dtype of the matmul operands (bf16 recommended on v6e/v7x).
    Returns:
      (B, C_out) float32
    """
    B, C_in, L = x_ncl.shape
    C_out, _, K = weight_ock.shape
    if L < K:
        raise ValueError(f"L={L} must be >= kernel_size={K}")
    L_out = L - K + 1
    C_out_pad = ((C_out + _LANE - 1) // _LANE) * _LANE

    # --- parameter re-layout (constant per model; do once at load time in practice) ---
    # w_fold[k*C_in + c, o] = weight_ock[o, c, k]   (k-major, c-minor)
    w_fold = jnp.transpose(weight_ock, (2, 1, 0)).reshape(K * C_in, C_out)
    w_fold = jnp.pad(w_fold, ((0, 0), (0, C_out_pad - C_out)))
    b_pad = jnp.pad(bias_o, (0, C_out_pad - C_out)).reshape(1, C_out_pad)  # stays f32

    # --- im2col LHS: cols[b, t, k*C_in + c] = x[b, c, t+k] ---
    x_blc = jnp.transpose(x_ncl, (0, 2, 1))                                     # (B, L, C_in)
    cols = jnp.concatenate([x_blc[:, k:k + L_out, :] for k in range(K)], -1)    # (B, L_out, K*C_in)

    if compute_dtype != jnp.float32:
        # bf16 only on the matmul operands; accumulation and the bias/ReLU/max
        # tail stay f32 (v5e has no bf16 VPU/EUP path).
        cols = cols.astype(compute_dtype)
        w_fold = w_fold.astype(compute_dtype)

    out_pad = pl.pallas_call(
        _cnn_kernel,
        out_shape=jax.ShapeDtypeStruct((B, C_out_pad), jnp.float32),
        in_specs=[
            pl.BlockSpec(memory_space=pltpu.MemorySpace.VMEM),
            pl.BlockSpec(memory_space=pltpu.MemorySpace.VMEM),
            pl.BlockSpec(memory_space=pltpu.MemorySpace.VMEM),
        ],
        out_specs=pl.BlockSpec(memory_space=pltpu.MemorySpace.VMEM),
        compiler_params=pltpu.CompilerParams(
            # Allow XLA to fuse the im2col/transpose producer of input 0 into the
            # pallas call's input fetch instead of a standalone HBM round trip.
            allow_input_fusion=[True, False, False]),
    )(cols, w_fold, b_pad)

    return out_pad[:, :C_out]


def _reference(x_ncl, weight_ock, bias_o):
    """Pure-JAX reference for Conv1d(valid) -> ReLU -> max over time."""
    B, C_in, L = x_ncl.shape
    C_out, _, K = weight_ock.shape
    L_out = L - K + 1
    cols = jnp.stack([x_ncl[:, :, k:k + L_out] for k in range(K)], axis=-1)  # (B,C_in,L_out,K)
    out = jnp.einsum('bclk,ock->bol', cols, weight_ock) + bias_o[None, :, None]
    out = jnp.maximum(out, 0.0)
    return out.max(axis=2)


if __name__ == "__main__":
    # Small shapes consistent with the char-CNN forward:
    #   B = b * sen_len = 8, C_in = e_char = 32, L = max_word = 16,
    #   C_out = e_word = 64, kernel_size = 5
    B, C_IN, L, C_OUT, K = 8, 32, 16, 64, 5

    key = jax.random.PRNGKey(0)
    kx, kw, kb = jax.random.split(key, 3)

    x = jax.random.normal(kx, (B, C_IN, L), dtype=jnp.float32)

    # Deterministic init mimicking PyTorch Conv1d defaults: U(-bound, bound),
    # bound = 1/sqrt(C_in * K)
    bound = 1.0 / (C_IN * K) ** 0.5
    weight = jax.random.uniform(kw, (C_OUT, C_IN, K), jnp.float32, -bound, bound)
    bias = jax.random.uniform(kb, (C_OUT,), jnp.float32, -bound, bound)

    ref = _reference(x, weight, bias)

    # f32 path (exact).
    out = jax.block_until_ready(cnn_forward(x, weight, bias))
    assert out.shape == (B, C_OUT)
    assert jnp.allclose(out, ref, atol=1e-4, rtol=1e-4), "f32 mismatch vs reference"

    # bf16-operand path (v6e/v7x option): f32 accumulation, loose tolerance.
    out_bf16 = jax.block_until_ready(
        cnn_forward(x, weight, bias, compute_dtype=jnp.bfloat16))
    assert out_bf16.shape == (B, C_OUT)
    assert jnp.allclose(out_bf16, ref, atol=3e-2, rtol=3e-2), "bf16 mismatch vs reference"

    print("KERNEL_OK")
</pallas_src>

<mosaic_0001>
module attributes {stable_mosaic.version = 11 : i64} {
  func.func @_cnn_kernel(%arg0: memref<8x12x160xf32, #tpu.memory_space<vmem>>, %arg1: memref<160x128xf32, #tpu.memory_space<vmem>>, %arg2: memref<1x128xf32, #tpu.memory_space<vmem>>, %arg3: memref<8x128xf32, #tpu.memory_space<vmem>>) attributes {dimension_semantics = [], scalar_prefetch = 0 : i64, scratch_operands = 0 : i64, tpu.core_type = #tpu.core_type<tc>} {
    %c0 = arith.constant 0 : index
    %c0_0 = arith.constant 0 : index
    %c0_1 = arith.constant 0 : index
    %0 = vector.load %arg0[%c0, %c0_0, %c0_1] : memref<8x12x160xf32, #tpu.memory_space<vmem>>, vector<8x12x160xf32>
    %c0_2 = arith.constant 0 : index
    %c0_3 = arith.constant 0 : index
    %1 = vector.load %arg1[%c0_2, %c0_3] : memref<160x128xf32, #tpu.memory_space<vmem>>, vector<160x128xf32>
    %cst = arith.constant dense<0.000000e+00> : vector<8x12x128xf32>
    %2 = tpu.matmul %0, %1, %cst {dimension_numbers = #tpu.dot_dimension_numbers<[2], [0], [0, 1], [1], [0, 0, 0, 1, 1, 1], [], []>} : vector<8x12x160xf32>, vector<160x128xf32>, vector<8x12x128xf32> -> vector<8x12x128xf32>
    %cst_4 = arith.constant dense<0xFF800000> : vector<8x128xf32>
    %3 = vector.multi_reduction <maximumf>, %2, %cst_4 [1] : vector<8x12x128xf32> to vector<8x128xf32>
    %c0_5 = arith.constant 0 : index
    %c0_6 = arith.constant 0 : index
    %4 = vector.load %arg2[%c0_5, %c0_6] : memref<1x128xf32, #tpu.memory_space<vmem>>, vector<1x128xf32>
    %5 = vector.broadcast %4 : vector<1x128xf32> to vector<8x128xf32>
    %6 = arith.addf %3, %5 : vector<8x128xf32>
    %cst_7 = arith.constant 0.000000e+00 : f32
    %7 = vector.broadcast %cst_7 : f32 to vector<8x128xf32>
    %8 = arith.maximumf %6, %7 : vector<8x128xf32>
    %c0_8 = arith.constant 0 : index
    %c0_9 = arith.constant 0 : index
    %9 = vector.load %arg3[%c0_8, %c0_9] : memref<8x128xf32, #tpu.memory_space<vmem>>, vector<8x128xf32>
    tpu.vector_store %arg3[%c0_8, %c0_9], %8 {strides = array<i32>} : memref<8x128xf32, #tpu.memory_space<vmem>>, vector<8x128xf32>,
    return
  }
}

</mosaic_0001>

<bundles_post_ra>
// kernel: cnn_forward.1
= control target key start
LH: loop header
LB: loop body
LE: loop exit
PB: predicated region body
PF: predicated region fallthrough
CT: control target
= control target key end

     0   :  { %v607_v3 = vmov 0.0|0.0   ;;  %vm159_vm0 = vcmask 261120   ;;  %s840_s0 = inlined_call_operand.vmem [shape: f32[8,12,160], index: 0, kind: input, shape index: {}]   ;;  %s841_s1 = inlined_call_operand.vmem [shape: f32[160,128], index: 1, kind: input, shape index: {}]   ;;  %s842_s2 = inlined_call_operand.vmem [shape: f32[1,128], index: 2, kind: input, shape index: {}]   ;;  %s843_s3 = inlined_call_operand.hbm [shape: f32[8,128], index: 3, kind: output, shape index: {}]  }
   0x1   :  { %v47_v0 = vld [vmem:[%s841_s1] sm:$0xff]  ;;  %v48_v1 = vld [vmem:[%s841_s1 + $0x8] sm:$0xff]  ;;  %v49_v2 = vld [vmem:[%s841_s1 + $0x10] sm:$0xff]  ;;  %515 = vmatprep.subr.bf16.mxu0 %v607_v3  ;;  %545 = vmatprep.subr.bf16.mxu1 %v607_v3 }
   0x2   :  { %v516_v4 = vpack.c.bf16 %v48_v1, %v47_v0  ;;  %v50_v5 = vld [vmem:[%s841_s1 + $0x18] sm:$0xff]  ;;  %v51_v7 = vld [vmem:[%s841_s1 + $0x20] sm:$0xff]  ;;  %v52_v8 = vld [vmem:[%s841_s1 + $0x28] sm:$0xff] }
   0x3   :  { %v519_v6 = vpack.c.bf16 %v50_v5, %v49_v2  ;;  %v16_v9 = vld [vmem:[%s840_s0 + $0x8] sm:$0xff]  ;;  %v522_v10 = vpack.c.bf16 %v52_v8, %v51_v7  ;;  %v53_v12 = vld [vmem:[%s841_s1 + $0x30] sm:$0xff]  ;;  %v54_v13 = vld [vmem:[%s841_s1 + $0x38] sm:$0xff] }
   0x4   :  { %517 = vmatpush1.bf16.msra.mxu0 %v516_v4  ;;  %555 = vmatpush1.bf16.msra.mxu1 %v516_v4  ;;  %v32_v11 = vld [vmem:[%s840_s0 + $0x88] sm:$0xff]  ;;  %v525_v14 = vpack.c.bf16 %v54_v13, %v53_v12  ;;  %v55_v15 = vld [vmem:[%s841_s1 + $0x40] sm:$0xff]  ;;  %v57_v18 = vld [vmem:[%s841_s1 + $0x50] sm:$0xff] }
   0x5   :  { %518 = vmatprep.subr.bf16.mxu0 %v607_v3  ;;  %546 = vmatprep.subr.bf16.mxu1 %v607_v3  ;;  %v56_v16 = vld [vmem:[%s841_s1 + $0x48] sm:$0xff]  ;;  %v58_v19 = vld [vmem:[%s841_s1 + $0x58] sm:$0xff] }
   0x6   :  { %502 = vmatprep.mubr.msk.f32.mxu0 %vm159_vm0, %v16_v9  ;;  %508 = vmatprep.mubr.msk.f32.mxu1 %vm159_vm0, %v32_v11  ;;  %v528_v17 = vpack.c.bf16 %v56_v16, %v55_v15 }
   0x8   :  { %520 = vmatpush1.bf16.msra.mxu0 %v519_v6  ;;  %556 = vmatpush1.bf16.msra.mxu1 %v519_v6 }
   0x9   :  { %521 = vmatprep.subr.bf16.mxu0 %v607_v3  ;;  %547 = vmatprep.subr.bf16.mxu1 %v607_v3 }
   0xc   :  { %523 = vmatpush1.bf16.msra.mxu0 %v522_v10  ;;  %557 = vmatpush1.bf16.msra.mxu1 %v522_v10 }
   0xd   :  { %524 = vmatprep.subr.bf16.mxu0 %v607_v3  ;;  %548 = vmatprep.subr.bf16.mxu1 %v607_v3 }
  0x10   :  { %526 = vmatpush1.bf16.msra.mxu0 %v525_v14  ;;  %558 = vmatpush1.bf16.msra.mxu1 %v525_v14 }
  0x11   :  { %527 = vmatprep.subr.bf16.mxu0 %v607_v3  ;;  %549 = vmatprep.subr.bf16.mxu1 %v607_v3 }
  0x12   :  { %8 = vsyncpa [#allocation3], 0  ;;  %v531_v20 = vpack.c.bf16 %v58_v19, %v57_v18  ;;  %v59_v21 = vld [vmem:[%s841_s1 + $0x60] sm:$0xff]  ;;  %v60_v22 = vld [vmem:[%s841_s1 + $0x68] sm:$0xff]  ;;  %vm353_vm1 = vcmask 1043456   ;;  %vm450_vm2 = vcmask 1041409  }
  0x13   :  { %v534_v23 = vpack.c.bf16 %v60_v22, %v59_v21  ;;  %v61_v24 = vld [vmem:[%s841_s1 + $0x70] sm:$0xff]  ;;  %v62_v25 = vld [vmem:[%s841_s1 + $0x78] sm:$0xff]  ;;  %v63_v27 = vld [vmem:[%s841_s1 + $0x80] sm:$0xff]  ;;  %vm453_vm3 = vcmask 1042434   ;;  %vm456_vm4 = vcmask 1043459   ;;  %vm459_vm5 = vcmask 1044484  }
  0x14   :  { %529 = vmatpush1.bf16.msra.mxu0 %v528_v17  ;;  %559 = vmatpush1.bf16.msra.mxu1 %v528_v17  ;;  %v537_v26 = vpack.c.bf16 %v62_v25, %v61_v24  ;;  %v64_v28 = vld [vmem:[%s841_s1 + $0x88] sm:$0xff]  ;;  %v65_v30 = vld [vmem:[%s841_s1 + $0x90] sm:$0xff]  ;;  %v66_v31 = vld [vmem:[%s841_s1 + $0x98] sm:$0xff]  ;;  %vm462_vm6 = vcmask 1045509   ;;  %vm465_vm7 = vcmask 1046534   ;;  %vm468_vm8 = vcmask 1047559  }
  0x15   :  { %530 = vmatprep.subr.bf16.mxu0 %v607_v3  ;;  %550 = vmatprep.subr.bf16.mxu1 %v607_v3  ;;  %v540_v29 = vpack.c.bf16 %v64_v28, %v63_v27  ;;  %v18_v32 = vld [vmem:[%s840_s0 + $0x18] sm:$0xf]  ;;  %v20_v33 = vld [vmem:[%s840_s0 + $0x28] sm:$0xff]  ;;  %v543_v34 = vpack.c.bf16 %v66_v31, %v65_v30  ;;  %v21_v37 = vld [vmem:[%s840_s0 + $0x30] sm:$0xf] }
  0x16   :  { %v34_v35 = vld [vmem:[%s840_s0 + $0x98] sm:$0xf]  ;;  %v36_v36 = vld [vmem:[%s840_s0 + $0xa8] sm:$0xff]  ;;  %v37_v39 = vld [vmem:[%s840_s0 + $0xb0] sm:$0xf]  ;;  %v487_v42 = vcombine.low %v18_v32, %v20_v33 }
  0x17   :  { %v22_v38 = vld [vmem:[%s840_s0 + $0x38] sm:$0xf]  ;;  %v15_v41 = vld [vmem:[%s840_s0] sm:$0xff]  ;;  %v17_v43 = vld [vmem:[%s840_s0 + $0x10] sm:$0xf]  ;;  %v495_v46 = vcombine.low %v34_v35, %v36_v36 }
  0x18   :  { %532 = vmatpush1.bf16.msra.mxu0 %v531_v20  ;;  %560 = vmatpush1.bf16.msra.mxu1 %v531_v20  ;;  %v38_v40 = vld [vmem:[%s840_s0 + $0xb8] sm:$0xf]  ;;  %v19_v44 = vld [vmem:[%s840_s0 + $0x20] sm:$0xff]  ;;  %v33_v47 = vld [vmem:[%s840_s0 + $0x90] sm:$0xf]  ;;  %v104_v49 = vcombine.low %v21_v37, %v22_v38 }
  0x19   :  { %533 = vmatprep.subr.bf16.mxu0 %v607_v3  ;;  %551 = vmatprep.subr.bf16.mxu1 %v607_v3  ;;  %v31_v45 = vld [vmem:[%s840_s0 + $0x80] sm:$0xff]  ;;  %v116_v50 = vcombine.low %v37_v39, %v38_v40  ;;  %v486_v51 = vcombine.low %v17_v43, %v19_v44  ;;  %v103_v53 = vcombine.high %v19_v44, %v20_v33  ;;  %v24_v59 = vld [vmem:[%s840_s0 + $0x48] sm:$0xff]  ;;  %v26_v61 = vld [vmem:[%s840_s0 + $0x58] sm:$0xf] }
  0x1a   :  { %v35_v48 = vld [vmem:[%s840_s0 + $0xa0] sm:$0xff]  ;;  %v489_v55 = vcombine.high %v20_v33, %v104_v49  ;;  %v40_v60 = vld [vmem:[%s840_s0 + $0xc8] sm:$0xff]  ;;  %v42_v63 = vld [vmem:[%s840_s0 + $0xd8] sm:$0xf] }
  0x1b   :  { %v494_v52 = vcombine.low %v33_v47, %v35_v48  ;;  %v115_v54 = vcombine.high %v35_v48, %v36_v36  ;;  %v497_v56 = vcombine.high %v36_v36, %v116_v50  ;;  %v488_v57 = vcombine.low %v103_v53, %v21_v37  ;;  %v28_v62 = vld [vmem:[%s840_s0 + $0x68] sm:$0xff]  ;;  %v29_v1 = vld [vmem:[%s840_s0 + $0x70] sm:$0xf]  ;;  %v30_v2 = vld [vmem:[%s840_s0 + $0x78] sm:$0xf] }
  0x1c   :  { %535 = vmatpush1.bf16.msra.mxu0 %v534_v23  ;;  %561 = vmatpush1.bf16.msra.mxu1 %v534_v23  ;;  %v44_v0 = vld [vmem:[%s840_s0 + $0xe8] sm:$0xff]  ;;  %v46_v4 = vld [vmem:[%s840_s0 + $0xf8] sm:$0xf]  ;;  %v23_v5 = vld [vmem:[%s840_s0 + $0x40] sm:$0xff]  ;;  %v491_v6 = vcombine.low %v26_v61, %v28_v62  ;;  %v110_v13 = vcombine.low %v29_v1, %v30_v2 }
  0x1d   :  { %536 = vmatprep.subr.bf16.mxu0 %v607_v3  ;;  %552 = vmatprep.subr.bf16.mxu1 %v607_v3  ;;  %v496_v58 = vcombine.low %v115_v54, %v37_v39  ;;  %v25_v7 = vld [vmem:[%s840_s0 + $0x50] sm:$0xf]  ;;  %v27_v8 = vld [vmem:[%s840_s0 + $0x60] sm:$0xff]  ;;  %v499_v10 = vcombine.low %v42_v63, %v44_v0 }
  0x1e   :  { %v39_v9 = vld [vmem:[%s840_s0 + $0xc0] sm:$0xff]  ;;  %v41_v11 = vld [vmem:[%s840_s0 + $0xd0] sm:$0xf]  ;;  %v490_v15 = vcombine.low %v25_v7, %v27_v8  ;;  %v109_v17 = vcombine.high %v27_v8, %v28_v62  ;;  %v493_v19 = vcombine.high %v28_v62, %v110_v13 }
  0x1f   :  { %v43_v12 = vld [vmem:[%s840_s0 + $0xe0] sm:$0xff] }
  0x20   :  { %538 = vmatpush1.bf16.msra.mxu0 %v537_v26  ;;  %562 = vmatpush1.bf16.msra.mxu1 %v537_v26  ;;  %v498_v16 = vcombine.low %v41_v11, %v43_v12  ;;  %v121_v18 = vcombine.high %v43_v12, %v44_v0  ;;  %v492_v21 = vcombine.low %v109_v17, %v29_v1 }
  0x21   :  { %539 = vmatprep.subr.bf16.mxu0 %v607_v3  ;;  %553 = vmatprep.subr.bf16.mxu1 %v607_v3 }
  0x24   :  { %541 = vmatpush1.bf16.msra.mxu0 %v540_v29  ;;  %563 = vmatpush1.bf16.msra.mxu1 %v540_v29 }
  0x25   :  { %542 = vmatprep.subr.bf16.mxu0 %v607_v3  ;;  %554 = vmatprep.subr.bf16.mxu1 %v607_v3  ;;  %v45_v3 = vld [vmem:[%s840_s0 + $0xf0] sm:$0xf] }
  0x26   :  { %v122_v14 = vcombine.low %v45_v3, %v46_v4  ;;  %v500_v22 = vcombine.low %v121_v18, %v45_v3 }
  0x28   :  { %544 = vmatpush1.bf16.msra.mxu0 %v543_v34  ;;  %564 = vmatpush1.bf16.msra.mxu1 %v543_v34  ;;  %v501_v20 = vcombine.high %v44_v0, %v122_v14 }
  0x2b   :  { %249 = vmatmul.mubr.f32.vlgmr.msra.gmra.mrb[0].mxu0 %v15_v41  ;;  %279 = vmatmul.mubr.f32.vlgmr.msra.gmra.mrb[0].mxu1 %v31_v45 }
  0x2c   :  { %503 = vmatprep.mubr.msk.f32.mxu0 %vm159_vm0, %v487_v42  ;;  %509 = vmatprep.mubr.msk.f32.mxu1 %vm159_vm0, %v495_v46 }
  0x2f   :  { %254 = vmatmul.mubr.f32.gmra.mrb[2].mxu0 %v486_v51  ;;  %284 = vmatmul.mubr.f32.gmra.mrb[2].mxu1 %v494_v52 }
  0x30   :  { %504 = vmatprep.mubr.msk.f32.mxu0 %vm159_vm0, %v489_v55  ;;  %510 = vmatprep.mubr.msk.f32.mxu1 %vm159_vm0, %v497_v56 }
  0x33   :  { %259 = vmatmul.mubr.f32.gmra.mrb[4].mxu0 %v488_v57  ;;  %289 = vmatmul.mubr.f32.gmra.mrb[4].mxu1 %v496_v58 }
  0x34   :  { %505 = vmatprep.mubr.msk.f32.mxu0 %vm159_vm0, %v24_v59  ;;  %511 = vmatprep.mubr.msk.f32.mxu1 %vm159_vm0, %v40_v60 }
  0x37   :  { %264 = vmatmul.mubr.f32.gmra.mrb[6].mxu0 %v23_v5  ;;  %294 = vmatmul.mubr.f32.gmra.mrb[6].mxu1 %v39_v9 }
  0x38   :  { %506 = vmatprep.mubr.msk.f32.mxu0 %vm159_vm0, %v491_v6  ;;  %512 = vmatprep.mubr.msk.f32.mxu1 %vm159_vm0, %v499_v10 }
  0x3b   :  { %269 = vmatmul.mubr.f32.gmra.mrb[8].mxu0 %v490_v15  ;;  %299 = vmatmul.mubr.f32.gmra.mrb[8].mxu1 %v498_v16 }
  0x3c   :  { %507 = vmatprep.mubr.msk.f32.mxu0 %vm159_vm0, %v493_v19  ;;  %513 = vmatprep.mubr.msk.f32.mxu1 %vm159_vm0, %v501_v20 }
  0x3f   :  { %274 = vmatmul.mubr.f32.gmra.mrb[10].mxu0 %v492_v21  ;;  %304 = vmatmul.mubr.f32.gmra.mrb[10].mxu1 %v500_v22 }
  0xfe   :  { %v250_v23 = vpop.f32.mrb[0].mxu0  ;;  %v280_v24 = vpop.f32.mrb[0].mxu1 }
  0xff   :  { %v321_v25 = vcombine.high %v250_v23, %v250_v23  ;;  %v252_v26 = vpop.f32.mrb[1].mxu0  ;;  %v327_v27 = vcombine.high %v280_v24, %v280_v24  ;;  %v282_v28 = vpop.f32.mrb[1].mxu1 }
 0x101   :  { %v337_v29 = vcombine.low %v250_v23, %v321_v25  ;;  %v341_v30 = vcombine.low %v280_v24, %v327_v27 }
 0x102   :  { %v255_v31 = vpop.f32.mrb[2].mxu0  ;;  %v285_v32 = vpop.f32.mrb[2].mxu1 }
 0x103   :  { %v354_v33 = vsel %vm353_vm1, %v255_v31, -inf  ;;  %v328_v34 = vcombine.high %v285_v32, %v285_v32  ;;  %v386_v35 = vsel %vm353_vm1, %v285_v32, -inf  ;;  %v257_v36 = vpop.f32.mrb[3].mxu0  ;;  %v287_v37 = vpop.f32.mrb[3].mxu1  ;;  %v322_v40 = vcombine.high %v255_v31, %v255_v31 }
 0x104   :  { %v355_v38 = vmax.f32 %v337_v29, %v354_v33  ;;  %v387_v39 = vmax.f32 %v341_v30, %v386_v35  ;;  %v514_v33 = vld [vmem:[%s842_s2] ss:$0 sm:$0xff]  ;;  %s608_s2 = smov [#allocation2]  }
 0x105   :  { %s478_s7 = sshll.u32 %s608_s2, 4  ;;  %s479_s7 = int_to_ptr.vmem [resolvable:$true] %s478_s7 }
 0x106   :  { %v356_v41 = vrot.slane %v355_v38, 4  ;;  %v260_v42 = vpop.f32.mrb[4].mxu0  ;;  %v290_v43 = vpop.f32.mrb[4].mxu1  ;;  %v388_v51 = vrot.slane %v387_v39, 4  ;;  %s583_s8 = scalar_lea.vmem %s479_s7, 128  ;;  %p588_p1 = scmp.lt.s32.totalorder %s479_s7, %s479_s7 }
 0x107   :  { %v323_v44 = vcombine.high %v260_v42, %v260_v42  ;;  %v338_v45 = vcombine.low %v322_v40, %v260_v42  ;;  %v329_v46 = vcombine.high %v290_v43, %v290_v43  ;;  %v342_v47 = vcombine.low %v328_v34, %v290_v43  ;;  %v262_v48 = vpop.f32.mrb[5].mxu0  ;;  %v292_v49 = vpop.f32.mrb[5].mxu1  ;;  %p584_p0 = scmp.ne.s32.totalorder %s479_s7, %s583_s8  ;;  %p589_p2 = scmp.lt.s32.totalorder %s583_s8, %s583_s8 }
 0x108   :  { %v357_v50 = vmax.f32 %v355_v38, %v356_v41  ;;  %v389_v0 = vmax.f32 %v387_v39, %v388_v51 }
 0x109   :  { %v362_v52 = vsel %vm353_vm1, %v323_v44, -inf  ;;  %v394_v53 = vsel %vm353_vm1, %v329_v46, -inf  ;;  %p590_p3 = por %p589_p2, %p588_p1 }
 0x10a   :  { %v358_v54 = vrot.slane %v357_v50, 2  ;;  %v363_v55 = vmax.f32 %v338_v45, %v362_v52  ;;  %v395_v56 = vmax.f32 %v342_v47, %v394_v53  ;;  %v265_v57 = vpop.f32.mrb[6].mxu0  ;;  %v295_v58 = vpop.f32.mrb[6].mxu1  ;;  %v390_v14 = vrot.slane %v389_v0, 2 }
 0x10b   :  { %v324_v59 = vcombine.high %v265_v57, %v265_v57  ;;  %v267_v60 = vpop.f32.mrb[7].mxu0  ;;  %v330_v61 = vcombine.high %v295_v58, %v295_v58  ;;  %v297_v62 = vpop.f32.mrb[7].mxu1  ;;  %p591_p4 = pnand %p590_p3, %p584_p0 }
 0x10c   :  { %v359_v63 = vmax.f32 %v357_v50, %v358_v54  ;;  %v364_v1 = vrot.slane %v363_v55, 4  ;;  %v396_v2 = vrot.slane %v395_v56, 4  ;;  %v391_v31 = vmax.f32 %v389_v0, %v390_v14 }
 0x10d   :  { %v339_v3 = vcombine.low %v265_v57, %v324_v59  ;;  %v343_v4 = vcombine.low %v295_v58, %v330_v61 }
 0x10e   :  { %v365_v5 = vmax.f32 %v363_v55, %v364_v1  ;;  %v397_v6 = vmax.f32 %v395_v56, %v396_v2  ;;  %v270_v7 = vpop.f32.mrb[8].mxu0  ;;  %v300_v8 = vpop.f32.mrb[8].mxu1  ;;  %v360_v13 = vrot.slane %v359_v63, 1  ;;  %v392_v48 = vrot.slane %v391_v31, 1 }
 0x10f   :  { %v370_v9 = vsel %vm353_vm1, %v270_v7, -inf  ;;  %v402_v10 = vsel %vm353_vm1, %v300_v8, -inf  ;;  %v272_v11 = vpop.f32.mrb[9].mxu0  ;;  %v302_v12 = vpop.f32.mrb[9].mxu1  ;;  %v325_v16 = vcombine.high %v270_v7, %v270_v7  ;;  %v331_v21 = vcombine.high %v300_v8, %v300_v8 }
 0x110   :  { %v366_v15 = vrot.slane %v365_v5, 2  ;;  %v371_v17 = vmax.f32 %v339_v3, %v370_v9  ;;  %v403_v18 = vmax.f32 %v343_v4, %v402_v10  ;;  %v398_v20 = vrot.slane %v397_v6, 2 }
 0x111   :  { %v361_v30 = vmax.f32 %v359_v63, %v360_v13  ;;  %v393_v61 = vmax.f32 %v391_v31, %v392_v48 }
 0x112   :  { %v367_v19 = vmax.f32 %v365_v5, %v366_v15  ;;  %v275_v22 = vpop.f32.mrb[10].mxu0  ;;  %v305_v23 = vpop.f32.mrb[10].mxu1  ;;  %v372_v24 = vrot.slane %v371_v17, 4  ;;  %v404_v25 = vrot.slane %v403_v18, 4  ;;  %v399_v39 = vmax.f32 %v397_v6, %v398_v20 }
 0x113   :  { %v326_v26 = vcombine.high %v275_v22, %v275_v22  ;;  %v340_v27 = vcombine.low %v325_v16, %v275_v22  ;;  %v277_v28 = vpop.f32.mrb[11].mxu0  ;;  %v307_v29 = vpop.f32.mrb[11].mxu1  ;;  %v332_v37 = vcombine.high %v305_v23, %v305_v23  ;;  %v344_v43 = vcombine.low %v331_v21, %v305_v23 }
 0x114   :  { %v368_v32 = vrot.slane %v367_v19, 1  ;;  %v373_v34 = vmax.f32 %v371_v17, %v372_v24  ;;  %v405_v35 = vmax.f32 %v403_v18, %v404_v25  ;;  %v425_v45 = vadd.f32 %v514_v33, %v361_v30 }
 0x115   :  { %v378_v36 = vsel %vm353_vm1, %v326_v26, -inf  ;;  %v410_v44 = vsel %vm353_vm1, %v332_v37, -inf  ;;  %v400_v53 = vrot.slane %v399_v39, 1  ;;  %v429_v7 = vadd.f32 %v514_v33, %v393_v61 }
 0x116   :  { %v369_v38 = vmax.f32 %v367_v19, %v368_v32  ;;  %v379_v40 = vmax.f32 %v340_v27, %v378_v36  ;;  %v374_v41 = vrot.slane %v373_v34, 2  ;;  %v406_v42 = vrot.slane %v405_v35, 2 }
 0x117   :  { %v411_v51 = vmax.f32 %v344_v43, %v410_v44  ;;  %v433_v58 = vmax.f32 %v425_v45, 0.0  ;;  %v401_v0 = vmax.f32 %v399_v39, %v400_v53  ;;  %v437_v16 = vmax.f32 %v429_v7, 0.0 }
 0x118   :  { %v426_v46 = vadd.f32 %v514_v33, %v369_v38  ;;  %v380_v47 = vrot.slane %v379_v40, 4  ;;  %v375_v49 = vmax.f32 %v373_v34, %v374_v41  ;;  %v407_v50 = vmax.f32 %v405_v35, %v406_v42 }
 0x119   :  { %v412_v57 = vrot.slane %v411_v51, 4  ;;  %v430_v10 = vadd.f32 %v514_v33, %v401_v0  ;;  %v458_v24 = vrot.slane %v437_v16, 4 }
 0x11a   :  { %v434_v52 = vmax.f32 %v426_v46, 0.0  ;;  %v381_v54 = vmax.f32 %v379_v40, %v380_v47  ;;  %v376_v55 = vrot.slane %v375_v49, 1  ;;  %v408_v56 = vrot.slane %v407_v50, 1 }
 0x11b   :  { %v413_v63 = vmax.f32 %v411_v51, %v412_v57  ;;  %v438_v20 = vmax.f32 %v430_v10, 0.0 }
 0x11c   :  { %v449_v59 = vrot.slane %v434_v52, 7  ;;  %v382_v60 = vrot.slane %v381_v54, 2  ;;  %v377_v62 = vmax.f32 %v375_v49, %v376_v55  ;;  %v409_v4 = vmax.f32 %v407_v50, %v408_v56 }
 0x11d   :  { %v414_v5 = vrot.slane %v413_v63, 2  ;;  %v461_v27 = vrot.slane %v438_v20, 3 }
 0x11e   :  { %v383_v1 = vmax.f32 %v381_v54, %v382_v60  ;;  %v451_v2 = vsel %vm450_vm2, %v449_v59, %v433_v58  ;;  %v427_v3 = vadd.f32 %v514_v33, %v377_v62  ;;  %v431_v14 = vadd.f32 %v514_v33, %v409_v4 }
 0x11f   :  { %v415_v9 = vmax.f32 %v413_v63, %v414_v5 }
 0x120   :  { %v384_v6 = vrot.slane %v383_v1, 1  ;;  %v435_v8 = vmax.f32 %v427_v3, 0.0  ;;  %v439_v22 = vmax.f32 %v431_v14, 0.0 }
 0x121   :  { %v416_v13 = vrot.slane %v415_v9, 1 }
 0x122   :  { %v385_v11 = vmax.f32 %v383_v1, %v384_v6  ;;  %v452_v12 = vrot.slane %v435_v8, 6  ;;  %v464_v29 = vrot.slane %v439_v22, 2 }
 0x123   :  { %v417_v17 = vmax.f32 %v415_v9, %v416_v13 }
 0x124   :  { %v428_v15 = vadd.f32 %v514_v33, %v385_v11  ;;  %v454_v18 = vsel %vm453_vm3, %v452_v12, %v451_v2 }
 0x125   :  { %v432_v21 = vadd.f32 %v514_v33, %v417_v17 }
 0x126   :  { %v436_v19 = vmax.f32 %v428_v15, 0.0 }
 0x127   :  { %v440_v25 = vmax.f32 %v432_v21, 0.0 }
 0x128   :  { %v455_v23 = vrot.slane %v436_v19, 5 }
 0x129   :  { %v467_v31 = vrot.slane %v440_v25, 1 }
 0x12a   :  { %v457_v26 = vsel %vm456_vm4, %v455_v23, %v454_v18 }
 0x12b   :  { %v460_v28 = vsel %vm459_vm5, %v458_v24, %v457_v26 }
 0x12c   :  { %v463_v30 = vsel %vm462_vm6, %v461_v27, %v460_v28 }
 0x12d   :  { %v466_v32 = vsel %vm465_vm7, %v464_v29, %v463_v30 }
 0x12e   :  { %v469_v33 = vsel %vm468_vm8, %v467_v31, %v466_v32 }
 0x12f   :  { %471 = vst [vmem:[#allocation2] sm:$0xff] %v469_v33 }
 0x130   :  { %594 = shalt.err (!%p591_p4)
}
 0x131   :  { %s595_s10 = scalar_lea.hbm %s843_s3, 128 }
 0x132   :  { %p596_p5 = scmp.ne.s32.totalorder %s843_s3, %s595_s10  ;;  %p599_p6 = scmp.lt.u32.totalorder %s595_s10, %s843_s3 }
 0x134   :  { %p601_p7 = pnand %p599_p6, %p596_p5 }
 0x136   :  { %604 = shalt.err (!%p601_p7)
}
 0x137   :  { %481 = dma.vmem_to_hbm [thread:$0]  %s479_s7, 128, %s843_s3, [#allocation3]  }
 0x138   :  { %605 = dma.done.wait [#allocation3], 128  }
 0x139   :  { %606 = vsyncadd [#allocation3], 4294967168 }
 0x13a   :  { %485 = vsyncpa [#allocation3], 1 }

</bundles_post_ra>
